<compile_context>
chip_gen: v7x
topology: tpu7x:2x2x1
jax: 0.10.0
libtpu: 0.0.40
codegen_flags: <defaults>
</compile_context>

<pallas_src>
import jax
import jax.numpy as jnp
import numpy as np
from jax.experimental import pallas as pl
from jax.experimental.pallas import tpu as pltpu

EPS = 1e-3  # epsilon of the PyTorch module


# --------------------------- pass 1: statistics ---------------------------- #
def _stats_kernel(onehot_ref, x_ref, sum1_ref, sum2_ref):
    """Partial per-(context, channel) sums for one spatial tile."""
    x = x_ref[...]                                # (N, C, THW) f32
    s1_nc = jnp.sum(x, axis=-1)                   # (N, C)  lane reduce
    s2_nc = jnp.sum(x * x, axis=-1)               # (N, C)
    oh = onehot_ref[...]                          # (K, N)  one-hot membership
    # Scatter-add per-sample sums into per-context rows (tiny: K*N*C elements).
    sum1_ref[0] = jnp.sum(oh[:, :, None] * s1_nc[None, :, :], axis=1)  # (K, C)
    sum2_ref[0] = jnp.sum(oh[:, :, None] * s2_nc[None, :, :], axis=1)  # (K, C)


# ------------------------------ pass 2: apply ------------------------------ #
def _apply_kernel(x_ref, scale_ref, shift_ref, o_ref):
    # Pure streaming: one multiply-add per element, unmasked lane-dense store.
    o_ref[...] = x_ref[...] * scale_ref[...] + shift_ref[...]


# ------------------------------- tiling utils ------------------------------ #
def _choose_spatial_tile(n, c, hw_pad, budget_bytes=12 * 1024 * 1024):
    """Largest multiple of 128 dividing hw_pad whose apply-pass footprint fits."""
    bytes_per_lane = 4 * 4 * n * c  # x + out blocks, each double-buffered, f32
    max_thw = max(budget_bytes // max(bytes_per_lane, 1), 128)
    best = 128
    t = 128
    while t <= hw_pad:
        if hw_pad % t == 0 and t <= max_thw:
            best = t
        t += 128
    # TODO(synk): if N*C is so large that even THW=128 exceeds the budget, an
    # additional batch/channel tile axis would be needed.
    return min(best, hw_pad)


def _compiler_params(n, c, thw):
    tile_bytes = 4 * n * c * thw
    needed = 4 * tile_bytes + (1 << 20)  # x + out double-buffered, plus slack
    # Cap at 48 MiB so the budget also fits v7x's 64 MiB physical VMEM.
    limit = int(min(max(needed, 16 * 1024 * 1024), 48 * 1024 * 1024))
    return pltpu.CompilerParams(
        dimension_semantics=("parallel",),
        vmem_limit_bytes=limit,
    )


# --------------------------------- wrapper --------------------------------- #
def context_norm(samples, contexts, gamma, beta, priors, eps=EPS):
    """samples: (N, C, *spatial); contexts: (N,) int; gamma/beta: (K, C); priors: (K,)."""
    shape = samples.shape
    N, C = int(shape[0]), int(shape[1])
    spatial = int(np.prod(shape[2:])) if len(shape) > 2 else 1
    K = int(priors.shape[0])

    hw_pad = ((spatial + 127) // 128) * 128
    x = samples.astype(jnp.float32).reshape(N, C, spatial)
    if hw_pad != spatial:
        # Zero padding contributes 0 to the sums; counts below use true `spatial`.
        x = jnp.pad(x, ((0, 0), (0, 0), (0, hw_pad - spatial)))

    ctx = contexts.astype(jnp.int32)
    onehot = (ctx[None, :] == jnp.arange(K, dtype=jnp.int32)[:, None]).astype(jnp.float32)  # (K, N)

    thw = _choose_spatial_tile(N, C, hw_pad)
    num_tiles = hw_pad // thw
    params = _compiler_params(N, C, thw)

    # ---- pass 1: per-(context, channel) partial statistics ------------------
    sum1_p, sum2_p = pl.pallas_call(
        _stats_kernel,
        out_shape=(jax.ShapeDtypeStruct((num_tiles, K, C), jnp.float32),
                   jax.ShapeDtypeStruct((num_tiles, K, C), jnp.float32)),
        grid=(num_tiles,),
        in_specs=[
            pl.BlockSpec((K, N), lambda t: (0, 0)),            # one-hot contexts
            pl.BlockSpec((N, C, thw), lambda t: (0, 0, t)),    # data tile
        ],
        out_specs=(pl.BlockSpec((1, K, C), lambda t: (t, 0, 0)),
                   pl.BlockSpec((1, K, C), lambda t: (t, 0, 0))),
        compiler_params=params,
    )(onehot, x)

    # ---- tiny (K, C) glue: BN statistics -> per-sample scale/shift ----------
    # TODO(synk): variance uses E[x^2] - mean^2 in f32 (matches BN math but can
    # cancel for large-mean data); a centered/Welford pass would be more robust.
    counts = jnp.maximum(jnp.sum(onehot, axis=1) * float(spatial), 1.0)[:, None]  # (K, 1)
    sum1 = jnp.sum(sum1_p, axis=0)                         # (K, C)
    sum2 = jnp.sum(sum2_p, axis=0)
    mean = sum1 / counts
    var = jnp.maximum(sum2 / counts - mean * mean, 0.0)    # biased variance (training BN)
    inv_std = jax.lax.rsqrt(var + eps)
    g = gamma.astype(jnp.float32)
    b = beta.astype(jnp.float32)
    inv_sqrt_prior = jax.lax.rsqrt(priors.astype(jnp.float32))[:, None]  # (K, 1)
    scale_kc = g * inv_std * inv_sqrt_prior                              # (K, C)
    shift_kc = (b - mean * g * inv_std) * inv_sqrt_prior                 # (K, C)

    valid = (ctx >= 0) & (ctx < K)                 # out-of-range ids pass through
    cidx = jnp.clip(ctx, 0, K - 1)
    scale_nc = jnp.where(valid[:, None], scale_kc[cidx], 1.0).reshape(N, C, 1)
    shift_nc = jnp.where(valid[:, None], shift_kc[cidx], 0.0).reshape(N, C, 1)

    # ---- pass 2: apply per-sample scale/shift (lane-dense streaming write) ---
    out = pl.pallas_call(
        _apply_kernel,
        out_shape=jax.ShapeDtypeStruct((N, C, hw_pad), jnp.float32),
        grid=(num_tiles,),
        in_specs=[
            pl.BlockSpec((N, C, thw), lambda t: (0, 0, t)),
            pl.BlockSpec((N, C, 1), lambda t: (0, 0, 0)),
            pl.BlockSpec((N, C, 1), lambda t: (0, 0, 0)),
        ],
        out_specs=pl.BlockSpec((N, C, thw), lambda t: (0, 0, t)),
        input_output_aliases={0: 0},   # reuse the (padded) input buffer for output
        compiler_params=params,
    )(x, scale_nc, shift_nc)

    return out[:, :, :spatial].reshape(shape).astype(samples.dtype)


# ------------------------------ reference ---------------------------------- #
def _reference_numpy(samples, contexts, gamma, beta, priors):
    """Faithful NumPy port of ContextNorm.forward (training-mode BatchNorm2d)."""
    x = np.array(samples, dtype=np.float64)
    ctx = np.array(contexts)
    out = x.copy()
    K = len(priors)
    for i in range(K):
        idx = np.where(ctx == i)[0]
        if idx.size == 0:
            continue
        grp = x[idx]                                       # (Ni, C, H, W)
        mean = grp.mean(axis=(0, 2, 3))
        var = grp.var(axis=(0, 2, 3))                      # biased, as BN uses for normalization
        normed = (grp - mean[None, :, None, None]) / np.sqrt(var + EPS)[None, :, None, None]
        normed = normed * np.array(gamma)[i][None, :, None, None] \
                        + np.array(beta)[i][None, :, None, None]
        normed *= 1.0 / np.sqrt(float(priors[i]))
        out[idx] = normed
    return out


if __name__ == "__main__":
    key = jax.random.PRNGKey(0)
    k_x, k_ctx = jax.random.split(key)

    N, C, H, W = 8, 4, 16, 16
    K = 3  # num_contexts

    samples = jax.random.normal(k_x, (N, C, H, W), dtype=jnp.float32)
    contexts = jax.random.randint(k_ctx, (N,), 0, K, dtype=jnp.int32)

    # Deterministic parameters matching the module's __init__:
    #   BatchNorm affine -> weight=1, bias=0 per context/channel; explicit priors.
    gamma = jnp.ones((K, C), dtype=jnp.float32)
    beta = jnp.zeros((K, C), dtype=jnp.float32)
    priors = jnp.array([0.5, 0.3, 0.2], dtype=jnp.float32)

    out = context_norm(samples, contexts, gamma, beta, priors)
    out = jax.block_until_ready(out)

    ref = _reference_numpy(np.array(samples), np.array(contexts),
                           np.array(gamma), np.array(beta), np.array(priors))
    np.testing.assert_allclose(np.array(out), ref, rtol=1e-3, atol=1e-3)

    print("KERNEL_OK")
</pallas_src>

<mosaic_0001>
module attributes {stable_mosaic.version = 11 : i64} {
  func.func @_stats_kernel(%arg0: i32, %arg1: memref<3x8xf32, #tpu.memory_space<vmem>>, %arg2: memref<8x4x256xf32, #tpu.memory_space<vmem>>, %arg3: memref<1x3x4xf32, #tpu.memory_space<vmem>>, %arg4: memref<1x3x4xf32, #tpu.memory_space<vmem>>) attributes {dimension_semantics = [#tpu.dimension_semantics<parallel>], iteration_bounds = array<i64: 1>, scalar_prefetch = 0 : i64, scratch_operands = 0 : i64, tpu.core_type = #tpu.core_type<tc>, window_params = [{pipeline_mode = #tpu.pipeline_mode<synchronous>, transform_indices = @transform_0, window_bounds = array<i64: 3, 8>}, {transform_indices = @transform_1, window_bounds = array<i64: 8, 4, 256>}, {transform_indices = @transform_2, window_bounds = array<i64: 1, 3, 4>}, {transform_indices = @transform_3, window_bounds = array<i64: 1, 3, 4>}]} {
    %c0 = arith.constant 0 : index
    %c0_0 = arith.constant 0 : index
    %c0_1 = arith.constant 0 : index
    %0 = vector.load %arg2[%c0, %c0_0, %c0_1] : memref<8x4x256xf32, #tpu.memory_space<vmem>>, vector<8x4x256xf32>
    %cst = arith.constant dense<0.000000e+00> : vector<8x4xf32>
    %1 = vector.multi_reduction <add>, %0, %cst [2] : vector<8x4x256xf32> to vector<8x4xf32>
    %2 = arith.mulf %0, %0 : vector<8x4x256xf32>
    %cst_2 = arith.constant dense<0.000000e+00> : vector<8x4xf32>
    %3 = vector.multi_reduction <add>, %2, %cst_2 [2] : vector<8x4x256xf32> to vector<8x4xf32>
    %c0_3 = arith.constant 0 : index
    %c0_4 = arith.constant 0 : index
    %4 = vector.load %arg1[%c0_3, %c0_4] : memref<3x8xf32, #tpu.memory_space<vmem>>, vector<3x8xf32>
    %5 = vector.shape_cast %4 : vector<3x8xf32> to vector<3x8x1xf32>
    %6 = vector.shape_cast %1 : vector<8x4xf32> to vector<1x8x4xf32>
    %7 = vector.broadcast %5 : vector<3x8x1xf32> to vector<3x8x4xf32>
    %8 = vector.broadcast %6 : vector<1x8x4xf32> to vector<3x8x4xf32>
    %9 = arith.mulf %7, %8 : vector<3x8x4xf32>
    %cst_5 = arith.constant dense<0.000000e+00> : vector<3x4xf32>
    %10 = vector.multi_reduction <add>, %9, %cst_5 [1] : vector<3x8x4xf32> to vector<3x4xf32>
    %c0_6 = arith.constant 0 : index
    %c0_7 = arith.constant 0 : index
    %c0_8 = arith.constant 0 : index
    %11 = vector.load %arg3[%c0_6, %c0_7, %c0_8] : memref<1x3x4xf32, #tpu.memory_space<vmem>>, vector<1x3x4xf32>
    %12 = vector.shape_cast %11 : vector<1x3x4xf32> to vector<3x4xf32>
    %13 = vector.shape_cast %10 : vector<3x4xf32> to vector<1x3x4xf32>
    tpu.vector_store %arg3[%c0_6, %c0_7, %c0_8], %13 {strides = array<i32>} : memref<1x3x4xf32, #tpu.memory_space<vmem>>, vector<1x3x4xf32>,
    %14 = vector.shape_cast %4 : vector<3x8xf32> to vector<3x8x1xf32>
    %15 = vector.shape_cast %3 : vector<8x4xf32> to vector<1x8x4xf32>
    %16 = vector.broadcast %14 : vector<3x8x1xf32> to vector<3x8x4xf32>
    %17 = vector.broadcast %15 : vector<1x8x4xf32> to vector<3x8x4xf32>
    %18 = arith.mulf %16, %17 : vector<3x8x4xf32>
    %cst_9 = arith.constant dense<0.000000e+00> : vector<3x4xf32>
    %19 = vector.multi_reduction <add>, %18, %cst_9 [1] : vector<3x8x4xf32> to vector<3x4xf32>
    %c0_10 = arith.constant 0 : index
    %c0_11 = arith.constant 0 : index
    %c0_12 = arith.constant 0 : index
    %20 = vector.load %arg4[%c0_10, %c0_11, %c0_12] : memref<1x3x4xf32, #tpu.memory_space<vmem>>, vector<1x3x4xf32>
    %21 = vector.shape_cast %20 : vector<1x3x4xf32> to vector<3x4xf32>
    %22 = vector.shape_cast %19 : vector<3x4xf32> to vector<1x3x4xf32>
    tpu.vector_store %arg4[%c0_10, %c0_11, %c0_12], %22 {strides = array<i32>} : memref<1x3x4xf32, #tpu.memory_space<vmem>>, vector<1x3x4xf32>,
    return
  }
  func.func @transform_0(%arg0: i32) -> (i32, i32) {
    %c0_i32 = arith.constant 0 : i32
    %c0_i32_0 = arith.constant 0 : i32
    %c0_i32_1 = arith.constant 0 : i32
    return %c0_i32, %c0_i32_0 : i32, i32
  }
  func.func @transform_1(%arg0: i32) -> (i32, i32, i32) {
    %c0_i32 = arith.constant 0 : i32
    %c0_i32_0 = arith.constant 0 : i32
    %c0_i32_1 = arith.constant 0 : i32
    return %c0_i32, %c0_i32_0, %arg0 : i32, i32, i32
  }
  func.func @transform_2(%arg0: i32) -> (i32, i32, i32) {
    %c0_i32 = arith.constant 0 : i32
    %c0_i32_0 = arith.constant 0 : i32
    %c0_i32_1 = arith.constant 0 : i32
    return %arg0, %c0_i32, %c0_i32_0 : i32, i32, i32
  }
  func.func @transform_3(%arg0: i32) -> (i32, i32, i32) {
    %c0_i32 = arith.constant 0 : i32
    %c0_i32_0 = arith.constant 0 : i32
    %c0_i32_1 = arith.constant 0 : i32
    return %arg0, %c0_i32, %c0_i32_0 : i32, i32, i32
  }
}

</mosaic_0001>

<bundles_post_ra>
// kernel: tpu_custom_call.1
= control target key start
LH: loop header
LB: loop body
LE: loop exit
PB: predicated region body
PF: predicated region fallthrough
CT: control target
= control target key end

     0   :  { %9 = vsyncpa [#allocation3], 0  ;;  %s584_s0 = inlined_call_operand.hbm [shape: f32[3,8], index: 0, kind: input, shape index: {}]   ;;  %s585_s1 = inlined_call_operand.hbm [shape: f32[8,4,256], index: 1, kind: input, shape index: {}]   ;;  %s586_s2 = inlined_call_operand.vmem [shape: f32[1,3,4], index: 2, kind: output, shape index: {0}]   ;;  %s587_s3 = inlined_call_operand.vmem [shape: f32[1,3,4], index: 3, kind: output, shape index: {1}]  }
   0x1   :  { %10 = vsyncpa [#allocation5], 0  ;;  %s445_s12 = smov [#allocation2]   ;;  %s446_s14 = smov [#allocation4]  }
   0x2   :  { %s17_s13 = sshll.u32 %s445_s12, 4  ;;  %s26_s15 = sshll.u32 %s446_s14, 4  ;;  %s18_s13 = int_to_ptr.vmem [resolvable:$true] %s17_s13  ;;  %s469_s15 = int_to_ptr.vmem [resolvable:$true] %s26_s15 }
   0x3   :  { %s397_s18 = scalar_lea.hbm %s584_s0, 64 }
   0x4   :  { %p398_p0 = scmp.ne.s32.totalorder %s584_s0, %s397_s18  ;;  %p401_p1 = scmp.lt.u32.totalorder %s397_s18, %s584_s0 }
   0x6   :  { %p403_p2 = pnand %p401_p1, %p398_p0 }
   0x8   :  { %406 = shalt.err (!%p403_p2)
}
   0x9   :  { %s407_s23 = scalar_lea.vmem %s18_s13, 64  ;;  %p412_p4 = scmp.lt.s32.totalorder %s18_s13, %s18_s13 }
   0xa   :  { %p408_p3 = scmp.ne.s32.totalorder %s18_s13, %s407_s23  ;;  %p413_p5 = scmp.lt.s32.totalorder %s407_s23, %s407_s23 }
   0xc   :  { %p414_p6 = por %p413_p5, %p412_p4 }
   0xe   :  { %p415_p7 = pnand %p414_p6, %p408_p3 }
  0x10   :  { %418 = shalt.err (!%p415_p7)
}
  0x11   :  { %20 = dma.hbm_to_vmem [thread:$0]  %s584_s0, 64, %s18_s13, [#allocation3]  }
  0x12   :  { %s419_s28 = scalar_lea.hbm %s585_s1, 1024 }
  0x13   :  { %p420_p8 = scmp.ne.s32.totalorder %s585_s1, %s419_s28  ;;  %p423_p9 = scmp.lt.u32.totalorder %s419_s28, %s585_s1 }
  0x15   :  { %p425_p10 = pnand %p423_p9, %p420_p8 }
  0x17   :  { %428 = shalt.err (!%p425_p10)
}
  0x18   :  { %s429_s6 = scalar_lea.vmem %s469_s15, 1024  ;;  %p434_p12 = scmp.lt.s32.totalorder %s469_s15, %s469_s15 }
  0x19   :  { %p430_p11 = scmp.ne.s32.totalorder %s469_s15, %s429_s6  ;;  %p435_p13 = scmp.lt.s32.totalorder %s429_s6, %s429_s6 }
  0x1b   :  { %p436_p0 = por %p435_p13, %p434_p12 }
  0x1d   :  { %p437_p1 = pnand %p436_p0, %p430_p11 }
  0x1f   :  { %440 = shalt.err (!%p437_p1)
}
  0x20   :  { %s447_s0 = smov 128   ;;  %s448_s7 = smov 8  }
  0x21   :  { %32 = dma.hbm_to_vmem [thread:$0]  %s585_s1, 1024, %s469_s15, [#allocation5], %s447_s0, %s447_s0, %s448_s7  }
  0x22   :  { %441 = dma.done.wait [#allocation3], 64  }
  0x23   :  { %442 = vsyncadd [#allocation3], 4294967232 }
  0x24   :  { %443 = dma.done.wait [#allocation5], 1024  }
  0x25   :  { %444 = vsyncadd [#allocation5], 4294966272  ;;  %v185_v0 = vlaneseq  ;;  %vm71_vm0 = vcmask 1043456   ;;  %v39_v4 = vld [vmem:[#allocation4] sm:$0xff]  ;;  %v40_v5 = vld [vmem:[#allocation4 + $0x8] sm:$0xff]  ;;  %vm248_vm1 = vcmask 1041409  }
  0x26   :  { %v41_v6 = vld [vmem:[#allocation4 + $0x10] sm:$0xff]  ;;  %v55_v7 = vcombine.high %v39_v4, %v39_v4  ;;  %v72_v8 = vsel %vm71_vm0, %v39_v4, 0.0  ;;  %v112_v9 = vmul.f32 %v39_v4, %v39_v4  ;;  %v56_v10 = vcombine.high %v40_v5, %v40_v5  ;;  %v42_v20 = vld [vmem:[#allocation4 + $0x18] sm:$0xff]  ;;  %v43_v27 = vld [vmem:[#allocation4 + $0x20] sm:$0xff] }
  0x27   :  { %v500_v1 = vshrl.u32 %v185_v0, 7  ;;  %v215_v2 = vand.u32 127, %v185_v0  ;;  %v77_v11 = vsel %vm71_vm0, %v40_v5, 0.0  ;;  %v113_v12 = vmul.f32 %v40_v5, %v40_v5  ;;  %v44_v39 = vld [vmem:[#allocation4 + $0x28] sm:$0xff]  ;;  %v45_v49 = vld [vmem:[#allocation4 + $0x30] sm:$0xff]  ;;  %v46_v59 = vld [vmem:[#allocation4 + $0x38] sm:$0xff] }
  0x28   :  { %v57_v13 = vcombine.high %v41_v6, %v41_v6  ;;  %v73_v14 = vsel %vm71_vm0, %v55_v7, 0.0  ;;  %v128_v15 = vcombine.high %v112_v9, %v112_v9  ;;  %v144_v16 = vsel %vm71_vm0, %v112_v9, 0.0 }
  0x29   :  { %v503_v3 = vsub.s32 %v215_v2, %v500_v1  ;;  %v78_v17 = vsel %vm71_vm0, %v56_v10, 0.0  ;;  %v74_v18 = vadd.f32 %v73_v14, %v72_v8  ;;  %v129_v19 = vcombine.high %v113_v12, %v113_v12 }
  0x2a   :  { %v145_v21 = vsel %vm71_vm0, %v128_v15, 0.0  ;;  %v149_v22 = vsel %vm71_vm0, %v113_v12, 0.0  ;;  %v114_v23 = vmul.f32 %v41_v6, %v41_v6  ;;  %v79_v25 = vadd.f32 %v78_v17, %v77_v11 }
  0x2b   :  { %75 = vadd.xlane.f32.xlu0 %v74_v18  ;;  %v146_v24 = vadd.f32 %v145_v21, %v144_v16  ;;  %v150_v26 = vsel %vm71_vm0, %v129_v19, 0.0  ;;  %v82_v28 = vsel %vm71_vm0, %v41_v6, 0.0  ;;  %v83_v29 = vsel %vm71_vm0, %v57_v13, 0.0 }
  0x2c   :  { %v130_v30 = vcombine.high %v114_v23, %v114_v23  ;;  %v58_v31 = vcombine.high %v42_v20, %v42_v20  ;;  %v151_v32 = vadd.f32 %v150_v26, %v149_v22  ;;  %v115_v33 = vmul.f32 %v42_v20, %v42_v20 }
  0x2d   :  { %147 = vadd.xlane.f32.xlu1 %v146_v24  ;;  %v154_v34 = vsel %vm71_vm0, %v114_v23, 0.0  ;;  %v116_v36 = vmul.f32 %v43_v27, %v43_v27  ;;  %v84_v37 = vadd.f32 %v83_v29, %v82_v28  ;;  %v87_v40 = vsel %vm71_vm0, %v42_v20, 0.0  ;;  %v184_v23 = vld [vmem:[#allocation2] sm:$0x7] }
  0x2e   :  { %v155_v35 = vsel %vm71_vm0, %v130_v30, 0.0  ;;  %v131_v38 = vcombine.high %v115_v33, %v115_v33  ;;  %v88_v41 = vsel %vm71_vm0, %v58_v31, 0.0  ;;  %v59_v42 = vcombine.high %v43_v27, %v43_v27 }
  0x2f   :  { %80 = vadd.xlane.f32.xlu0 %v79_v25  ;;  %v156_v43 = vadd.f32 %v155_v35, %v154_v34  ;;  %v159_v44 = vsel %vm71_vm0, %v115_v33, 0.0  ;;  %v132_v46 = vcombine.high %v116_v36, %v116_v36  ;;  %v117_v47 = vmul.f32 %v44_v39, %v44_v39 }
  0x30   :  { %v160_v45 = vsel %vm71_vm0, %v131_v38, 0.0  ;;  %v89_v48 = vadd.f32 %v88_v41, %v87_v40  ;;  %v92_v50 = vsel %vm71_vm0, %v43_v27, 0.0  ;;  %v93_v51 = vsel %vm71_vm0, %v59_v42, 0.0 }
  0x31   :  { %152 = vadd.xlane.f32.xlu1 %v151_v32  ;;  %v60_v52 = vcombine.high %v44_v39, %v44_v39  ;;  %v161_v53 = vadd.f32 %v160_v45, %v159_v44  ;;  %v164_v54 = vsel %vm71_vm0, %v116_v36, 0.0  ;;  %v165_v55 = vsel %vm71_vm0, %v132_v46, 0.0 }
  0x32   :  { %v133_v56 = vcombine.high %v117_v47, %v117_v47  ;;  %v118_v57 = vmul.f32 %v45_v49, %v45_v49  ;;  %v94_v58 = vadd.f32 %v93_v51, %v92_v50  ;;  %v97_v60 = vsel %vm71_vm0, %v44_v39, 0.0 }
  0x33   :  { %85 = vadd.xlane.f32.xlu0 %v84_v37  ;;  %v98_v61 = vsel %vm71_vm0, %v60_v52, 0.0  ;;  %v61_v62 = vcombine.high %v45_v49, %v45_v49  ;;  %v166_v63 = vadd.f32 %v165_v55, %v164_v54  ;;  %v169_v0 = vsel %vm71_vm0, %v117_v47, 0.0 }
  0x34   :  { %v170_v2 = vsel %vm71_vm0, %v133_v56, 0.0  ;;  %v134_v4 = vcombine.high %v118_v57, %v118_v57  ;;  %v119_v5 = vmul.f32 %v46_v59, %v46_v59  ;;  %v99_v6 = vadd.f32 %v98_v61, %v97_v60 }
  0x35   :  { %157 = vadd.xlane.f32.xlu1 %v156_v43  ;;  %v102_v7 = vsel %vm71_vm0, %v45_v49, 0.0  ;;  %v103_v8 = vsel %vm71_vm0, %v61_v62, 0.0  ;;  %v62_v9 = vcombine.high %v46_v59, %v46_v59  ;;  %v171_v10 = vadd.f32 %v170_v2, %v169_v0 }
  0x36   :  { %v174_v11 = vsel %vm71_vm0, %v118_v57, 0.0  ;;  %v175_v12 = vsel %vm71_vm0, %v134_v4, 0.0  ;;  %v135_v13 = vcombine.high %v119_v5, %v119_v5  ;;  %v104_v14 = vadd.f32 %v103_v8, %v102_v7 }
  0x37   :  { %90 = vadd.xlane.f32.xlu0 %v89_v48  ;;  %v107_v15 = vsel %vm71_vm0, %v46_v59, 0.0  ;;  %v108_v16 = vsel %vm71_vm0, %v62_v9, 0.0  ;;  %v176_v17 = vadd.f32 %v175_v12, %v174_v11  ;;  %v179_v18 = vsel %vm71_vm0, %v119_v5, 0.0 }
  0x38   :  { %v180_v19 = vsel %vm71_vm0, %v135_v13, 0.0  ;;  %v109_v20 = vadd.f32 %v108_v16, %v107_v15  ;;  %v194_v22 = vsub.s32 1, %v500_v1  ;;  %v187_v24 = vsub.s32 0, %v500_v1 }
  0x39   :  { %162 = vadd.xlane.f32.xlu1 %v161_v53  ;;  %v181_v21 = vadd.f32 %v180_v19, %v179_v18  ;;  %v201_v26 = vsub.s32 2, %v500_v1  ;;  %vm250_vm2 = vcmask 1042434   ;;  %vm252_vm3 = vcmask 1043459  }
  0x3a   :  { %v195_v25 = vrot.slane %v184_v23, %v194_v22  ;;  %v188_v27 = vrot.slane %v184_v23, %v187_v24  ;;  %vm254_vm4 = vcmask 1044484   ;;  %vm256_vm5 = vcmask 1045509  }
  0x3b   :  { %95 = vadd.xlane.f32.xlu0 %v94_v58  ;;  %v202_v28 = vrot.slane %v184_v23, %v201_v26  ;;  %vm258_vm6 = vcmask 1046534   ;;  %vm260_vm7 = vcmask 1047559   ;;  %vm266_vm8 = vcmask 31744  }
  0x3c   :  { %vm294_vm9 = vcmask 26624  }
  0x3d   :  { %167 = vadd.xlane.f32.xlu1 %v166_v63 }
  0x3f   :  { %100 = vadd.xlane.f32.xlu0 %v99_v6 }
  0x41   :  { %172 = vadd.xlane.f32.xlu1 %v171_v10 }
  0x43   :  { %105 = vadd.xlane.f32.xlu0 %v104_v14 }
  0x45   :  { %177 = vadd.xlane.f32.xlu1 %v176_v17 }
  0x47   :  { %110 = vadd.xlane.f32.xlu0 %v109_v20 }
  0x49   :  { %182 = vadd.xlane.f32.xlu1 %v181_v21 }
  0x5a   :  { %197 = vbcast.lane.b32.xlu1 %v195_v25, 256 }
  0x5d   :  { %190 = vbcast.lane.b32.xlu0 %v188_v27, 256 }
  0x5e   :  { %204 = vbcast.lane.b32.xlu1 %v202_v28, 256 }
  0xb8   :  { %v76_v29 = vpop.xlane.xlu0 %75 }
  0xb9   :  { %v219_v40 = vrot.slane %v76_v29, %v503_v3 }
  0xba   :  { %v148_v30 = vpop.xlane.xlu1 %147 }
  0xbb   :  { %v307_v48 = vrot.slane %v148_v30, %v503_v3 }
  0xbc   :  { %v81_v31 = vpop.xlane.xlu0 %80 }
  0xbd   :  { %v223_v1 = vrot.slane %v81_v31, %v503_v3 }
  0xbe   :  { %v153_v32 = vpop.xlane.xlu1 %152 }
  0xbf   :  { %v311_v43 = vrot.slane %v153_v32, %v503_v3  ;;  %v249_v49 = vsel %vm248_vm1, %v223_v1, %v219_v40 }
  0xc0   :  { %v86_v33 = vpop.xlane.xlu0 %85 }
  0xc1   :  { %v227_v41 = vrot.slane %v86_v33, %v503_v3  ;;  %v336_v56 = vsel %vm248_vm1, %v311_v43, %v307_v48 }
  0xc2   :  { %v158_v34 = vpop.xlane.xlu1 %157 }
  0xc3   :  { %v315_v45 = vrot.slane %v158_v34, %v503_v3  ;;  %v251_v52 = vsel %vm250_vm2, %v227_v41, %v249_v49 }
  0xc4   :  { %v91_v35 = vpop.xlane.xlu0 %90 }
  0xc5   :  { %v231_v44 = vrot.slane %v91_v35, %v503_v3  ;;  %v337_v59 = vsel %vm250_vm2, %v315_v45, %v336_v56 }
  0xc6   :  { %v163_v36 = vpop.xlane.xlu1 %162 }
  0xc7   :  { %v319_v50 = vrot.slane %v163_v36, %v503_v3  ;;  %v253_v57 = vsel %vm252_vm3, %v231_v44, %v251_v52 }
  0xc8   :  { %v96_v37 = vpop.xlane.xlu0 %95 }
  0xc9   :  { %v235_v46 = vrot.slane %v96_v37, %v503_v3  ;;  %v338_v63 = vsel %vm252_vm3, %v319_v50, %v337_v59 }
  0xca   :  { %v168_v38 = vpop.xlane.xlu1 %167 }
  0xcb   :  { %v323_v53 = vrot.slane %v168_v38, %v503_v3  ;;  %v255_v60 = vsel %vm254_vm4, %v235_v46, %v253_v57 }
  0xcc   :  { %v101_v39 = vpop.xlane.xlu0 %100 }
  0xcd   :  { %v239_v51 = vrot.slane %v101_v39, %v503_v3  ;;  %v339_v4 = vsel %vm254_vm4, %v323_v53, %v338_v63 }
  0xce   :  { %v173_v42 = vpop.xlane.xlu1 %172 }
  0xcf   :  { %v327_v58 = vrot.slane %v173_v42, %v503_v3  ;;  %v257_v0 = vsel %vm256_vm5, %v239_v51, %v255_v60 }
  0xd0   :  { %v106_v47 = vpop.xlane.xlu0 %105 }
  0xd1   :  { %v243_v54 = vrot.slane %v106_v47, %v503_v3  ;;  %v340_v7 = vsel %vm256_vm5, %v327_v58, %v339_v4 }
  0xd2   :  { %v178_v55 = vpop.xlane.xlu1 %177 }
  0xd3   :  { %v331_v61 = vrot.slane %v178_v55, %v503_v3  ;;  %v259_v6 = vsel %vm258_vm6, %v243_v54, %v257_v0 }
  0xd4   :  { %v111_v62 = vpop.xlane.xlu0 %110 }
  0xd5   :  { %v247_v2 = vrot.slane %v111_v62, %v503_v3  ;;  %v341_v10 = vsel %vm258_vm6, %v331_v61, %v340_v7 }
  0xd6   :  { %v183_v5 = vpop.xlane.xlu1 %182 }
  0xd7   :  { %v335_v8 = vrot.slane %v183_v5, %v503_v3  ;;  %v261_v9 = vsel %vm260_vm7, %v247_v2, %v259_v6 }
  0xd8   :  { %v191_v11 = vpop.permute.xlu0 %190 }
  0xd9   :  { %v342_v12 = vsel %vm260_vm7, %v335_v8, %v341_v10  ;;  %v263_v13 = vmul.f32 %v261_v9, %v191_v11 }
  0xda   :  { %v344_v14 = vmul.f32 %v342_v12, %v191_v11  ;;  %v198_v15 = vpop.permute.xlu1 %197 }
  0xdb   :  { %v267_v16 = vsel %vm266_vm8, %v263_v13, 0.0  ;;  %v264_v17 = vmul.f32 %v261_v9, %v198_v15  ;;  %v345_v18 = vmul.f32 %v342_v12, %v198_v15 }
  0xdc   :  { %v268_v19 = vrot.slane %v267_v16, 4  ;;  %v347_v20 = vsel %vm266_vm8, %v344_v14, 0.0 }
  0xdd   :  { %v348_v21 = vrot.slane %v347_v20, 4  ;;  %v274_v22 = vsel %vm266_vm8, %v264_v17, 0.0  ;;  %v354_v3 = vsel %vm266_vm8, %v345_v18, 0.0 }
  0xde   :  { %v269_v23 = vadd.f32 %v268_v19, %v267_v16  ;;  %v275_v24 = vrot.slane %v274_v22, 4  ;;  %v355_v25 = vrot.slane %v354_v3, 4  ;;  %v205_v26 = vpop.permute.xlu1 %204 }
  0xdf   :  { %v349_v27 = vadd.f32 %v348_v21, %v347_v20  ;;  %v265_v28 = vmul.f32 %v261_v9, %v205_v26  ;;  %v346_v29 = vmul.f32 %v342_v12, %v205_v26 }
  0xe0   :  { %v270_v30 = vrot.slane %v269_v23, 2  ;;  %v276_v31 = vadd.f32 %v275_v24, %v274_v22  ;;  %v356_v32 = vadd.f32 %v355_v25, %v354_v3 }
  0xe1   :  { %v350_v33 = vrot.slane %v349_v27, 2  ;;  %v281_v34 = vsel %vm266_vm8, %v265_v28, 0.0  ;;  %v361_v35 = vsel %vm266_vm8, %v346_v29, 0.0 }
  0xe2   :  { %v277_v36 = vrot.slane %v276_v31, 2  ;;  %v357_v37 = vrot.slane %v356_v32, 2  ;;  %v282_v38 = vrot.slane %v281_v34, 4  ;;  %v271_v39 = vadd.f32 %v270_v30, %v269_v23 }
  0xe3   :  { %v351_v40 = vadd.f32 %v350_v33, %v349_v27  ;;  %v362_v1 = vrot.slane %v361_v35, 4 }
  0xe4   :  { %v278_v41 = vadd.f32 %v277_v36, %v276_v31  ;;  %v358_v42 = vadd.f32 %v357_v37, %v356_v32  ;;  %v283_v43 = vadd.f32 %v282_v38, %v281_v34  ;;  %v272_v49 = vrot.slane %v271_v39, 1 }
  0xe5   :  { %v363_v44 = vadd.f32 %v362_v1, %v361_v35  ;;  %v352_v45 = vrot.slane %v351_v40, 1 }
  0xe6   :  { %v279_v46 = vrot.slane %v278_v41, 1  ;;  %v359_v47 = vrot.slane %v358_v42, 1  ;;  %v284_v48 = vrot.slane %v283_v43, 2  ;;  %v273_v57 = vadd.f32 %v272_v49, %v271_v39 }
  0xe7   :  { %v364_v50 = vrot.slane %v363_v44, 2  ;;  %v353_v54 = vadd.f32 %v352_v45, %v351_v40 }
  0xe8   :  { %v285_v51 = vadd.f32 %v284_v48, %v283_v43  ;;  %v280_v52 = vadd.f32 %v279_v46, %v278_v41  ;;  %v360_v55 = vadd.f32 %v359_v47, %v358_v42 }
  0xe9   :  { %v365_v53 = vadd.f32 %v364_v50, %v363_v44 }
  0xea   :  { %v286_v56 = vrot.slane %v285_v51, 1  ;;  %v291_v60 = vsel %vm248_vm1, %v280_v52, %v273_v57  ;;  %v371_v62 = vsel %vm248_vm1, %v360_v55, %v353_v54 }
  0xeb   :  { %v366_v58 = vrot.slane %v365_v53, 1 }
  0xec   :  { %v287_v59 = vadd.f32 %v286_v56, %v285_v51 }
  0xed   :  { %v367_v61 = vadd.f32 %v366_v58, %v365_v53 }
  0xee   :  { %v292_v63 = vsel %vm250_vm2, %v287_v59, %v291_v60 }
  0xef   :  { %295 = vst.msk [vmem:[%s586_s2] sm:$0x7] %vm294_vm9, %v292_v63  ;;  %v372_v0 = vsel %vm250_vm2, %v367_v61, %v371_v62 }
  0xf0   :  { %374 = vst.msk [vmem:[%s587_s3] sm:$0x7] %vm294_vm9, %v372_v0 }
  0xf1   :  { %383 = vsyncpa [#allocation3], 1 }
  0xf2   :  { %384 = vsyncpa [#allocation5], 1 }

</bundles_post_ra>
